<compile_context>
chip_gen: v7x
topology: tpu7x:2x2x1
jax: 0.10.0
libtpu: 0.0.40
codegen_flags: <defaults>
</compile_context>

<pallas_src>
import jax
import jax.numpy as jnp
import numpy as np
from jax.experimental import pallas as pl
from jax.experimental.pallas import tpu as pltpu


# ----------------------------------------------------------------------------
# Kernel body: one (Cout, Cin) x (Cin, tile) matmul + bias on the MXU.
# ----------------------------------------------------------------------------
def _conv1x1_kernel(x_ref, w_ref, b_ref, o_ref):
    # x_ref: (Cin, T)   w_ref: (Cout, Cin)   b_ref: (Cout, 1)   o_ref: (Cout, T)
    acc = jnp.dot(w_ref[...], x_ref[...], preferred_element_type=jnp.float32)
    o_ref[...] = (acc + b_ref[...]).astype(o_ref.dtype)


# ----------------------------------------------------------------------------
# VMEM-budget-driven tiling.
# ----------------------------------------------------------------------------
def _vmem_capacity_bytes():
    """Physical VMEM per TensorCore; conservative fallback if query fails."""
    try:
        cap = int(pltpu.get_tpu_info().vmem_capacity_bytes)
        if cap > 0:
            return cap
    except Exception:
        pass
    return 64 << 20  # assume v7x-sized VMEM (smallest of the three generations)


def _choose_tile(L, Cin, Cout, itemsize, vmem_capacity):
    """Largest 128-multiple lane tile that keeps double-buffered I/O in budget."""
    # ~24 MiB budget on v7x (64 MiB VMEM), capped at 32 MiB on v5e/v6e (128 MiB).
    budget = min((vmem_capacity * 3) // 8, 32 << 20)
    per_lane = itemsize * (Cin + Cout) * 2          # x-tile + out-tile, 2 buffers each
    max_tile = max(128, budget // max(per_lane, 1))
    cap = min(max_tile, 4096)                       # diminishing returns past 4096
    if L <= cap:
        return L                                    # full extent: always a legal block
    return max(128, (cap // 128) * 128)             # ragged last tile handled by Pallas


# ----------------------------------------------------------------------------
# Grouped 1x1 conv: x (G, Cin, L)  ->  out (G, Cout, L).
# If per_group_params=False, all groups share weight/bias index 0.
# ----------------------------------------------------------------------------
def _conv1x1_grouped(x_gcl, w_g, b_g, *, per_group_params):
    G, Cin, L = x_gcl.shape
    _, Cout, _ = w_g.shape
    itemsize = jnp.dtype(x_gcl.dtype).itemsize

    cap = _vmem_capacity_bytes()
    tile = _choose_tile(L, Cin, Cout, itemsize, cap)
    grid = (G, pl.cdiv(L, tile))

    if per_group_params:
        w_idx = lambda g, t: (g, 0, 0)
    else:
        w_idx = lambda g, t: (0, 0, 0)

    # Explicit VMEM limit sized to the chosen tile (+ resident weights, + slack).
    vmem_used = (2 * (Cin + Cout) * tile + 2 * (Cout * Cin + Cout)) * itemsize
    vmem_limit = int(max(16 << 20, min(cap, vmem_used + (8 << 20))))

    cost = pl.CostEstimate(
        flops=2 * G * Cin * Cout * L,
        transcendentals=0,
        bytes_accessed=int(
            (x_gcl.size + G * Cout * L + w_g.size + b_g.size) * itemsize
        ),
    )

    return pl.pallas_call(
        _conv1x1_kernel,
        out_shape=jax.ShapeDtypeStruct((G, Cout, L), x_gcl.dtype),
        grid_spec=pltpu.PrefetchScalarGridSpec(
            num_scalar_prefetch=0,
            grid=grid,
            in_specs=[
                # x tile: (Cin, tile), leading group dim squeezed away.
                pl.BlockSpec((None, Cin, tile), lambda g, t: (g, 0, t)),
                # weight / bias: resident across the lane-tile axis.
                pl.BlockSpec((None, Cout, Cin), w_idx),
                pl.BlockSpec((None, Cout, 1), w_idx),
            ],
            out_specs=pl.BlockSpec((None, Cout, tile), lambda g, t: (g, 0, t)),
        ),
        compiler_params=pltpu.CompilerParams(
            dimension_semantics=("parallel", "parallel"),
            vmem_limit_bytes=vmem_limit,
        ),
        cost_estimate=cost,
    )(x_gcl, w_g, b_g)


# ----------------------------------------------------------------------------
# Public wrappers.
# ----------------------------------------------------------------------------
def conv1x1(x_nchw, weight, bias):
    """Single 1x1 conv, NCHW in / NCHW out (batch is the group axis)."""
    N, Cin, H, W = x_nchw.shape
    Cout = weight.shape[0]
    x = x_nchw.reshape(N, Cin, H * W)                 # contiguous, no transpose
    out = _conv1x1_grouped(
        x, weight[None], bias.reshape(1, Cout, 1), per_group_params=False
    )
    return out.reshape(N, Cout, H, W)


def conv1x1_fused_same_shape(xs, ws, bs):
    """Fuse several same-shape 1x1 convs (tiny pyramid levels) into one call.

    Lays each level out as (Cin, N*H*W) so the lane axis is N*HW (lane-dense
    stores, no per-batch grid axis).  The transposes/stacks touch only a few KB.
    """
    N, Cin, H, W = xs[0].shape
    Cout = ws[0].shape[0]
    G = len(xs)
    x_g = jnp.stack(
        [jnp.transpose(x, (1, 0, 2, 3)).reshape(Cin, N * H * W) for x in xs], axis=0
    )
    w_g = jnp.stack(ws, axis=0)
    b_g = jnp.stack(bs, axis=0).reshape(G, Cout, 1)
    out = _conv1x1_grouped(x_g, w_g, b_g, per_group_params=True)  # (G, Cout, N*HW)
    out = out.reshape(G, Cout, N, H, W).transpose(0, 2, 1, 3, 4)  # (G, N, Cout, H, W)
    return [out[i] for i in range(G)]


def init_params(channels, key):
    """Deterministic synthetic parameters (PyTorch-like uniform fan-in init)."""
    m2_c, m3_c, m456_c = channels
    specs = [m2_c, m3_c, m456_c, m456_c, m456_c]
    params = []
    for c in specs:
        key, kw, kb = jax.random.split(key, 3)
        bound = 1.0 / np.sqrt(float(c))
        w = jax.random.uniform(kw, (c, c), jnp.float32, -bound, bound)
        b = jax.random.uniform(kb, (c,), jnp.float32, -bound, bound)
        params.append((w, b))
    return params


def detnet_decoder_forward(inputs, params):
    """inputs: (m2, m3, m4, m5, m6) NCHW tensors; params: list of (W, b)."""
    m2, m3, m4, m5, m6 = inputs
    (w2, b2), (w3, b3), (w4, b4), (w5, b5), (w6, b6) = params

    out2 = conv1x1(m2, w2, b2)
    out3 = conv1x1(m3, w3, b3)

    if m4.shape == m5.shape == m6.shape:
        out4, out5, out6 = conv1x1_fused_same_shape(
            [m4, m5, m6], [w4, w5, w6], [b4, b5, b6]
        )
    else:
        out4 = conv1x1(m4, w4, b4)
        out5 = conv1x1(m5, w5, b5)
        out6 = conv1x1(m6, w6, b6)

    return out2, out3, out4, out5, out6


def _ref_conv1x1(x, w, b):
    """Pure-numpy reference: 1x1 conv on NCHW."""
    x, w, b = np.asarray(x), np.asarray(w), np.asarray(b)
    return np.einsum("oc,nchw->nohw", w, x) + b[None, :, None, None]


if __name__ == "__main__":
    key = jax.random.PRNGKey(0)
    channels = [8, 16, 32]          # small stand-in for the real [64, 128, 256]
    params = init_params(channels, key)

    # Small FPN-like pyramid; m2 is large enough (72*72 = 5184 > 4096) to
    # exercise the multi-tile + ragged-last-tile path.
    key, k2, k3, k4, k5, k6 = jax.random.split(key, 6)
    m2 = jax.random.normal(k2, (2, channels[0], 72, 72), jnp.float32)
    m3 = jax.random.normal(k3, (2, channels[1], 36, 36), jnp.float32)
    m4 = jax.random.normal(k4, (2, channels[2], 9, 9), jnp.float32)
    m5 = jax.random.normal(k5, (2, channels[2], 9, 9), jnp.float32)
    m6 = jax.random.normal(k6, (2, channels[2], 9, 9), jnp.float32)

    inputs = (m2, m3, m4, m5, m6)
    outs = detnet_decoder_forward(inputs, params)
    outs = jax.block_until_ready(outs)

    # sanity: 1x1 conv with Cin == Cout preserves shapes
    for o, x in zip(outs, inputs):
        assert o.shape == x.shape, (o.shape, x.shape)

    # numerical sanity vs. a pure-numpy reference (loose tol for MXU precision)
    for o, x, (w, b) in zip(outs, inputs, params):
        ref = _ref_conv1x1(x, w, b)
        np.testing.assert_allclose(np.asarray(o), ref, rtol=2e-2, atol=2e-2)

    print("KERNEL_OK")
</pallas_src>

<mosaic_0001>
module attributes {stable_mosaic.version = 11 : i64} {
  func.func @_conv1x1_kernel(%arg0: i32, %arg1: i32, %arg2: memref<1x8x4096xf32, #tpu.memory_space<vmem>>, %arg3: memref<1x8x8xf32, #tpu.memory_space<vmem>>, %arg4: memref<1x8x1xf32, #tpu.memory_space<vmem>>, %arg5: memref<1x8x4096xf32, #tpu.memory_space<vmem>>) attributes {dimension_semantics = [#tpu.dimension_semantics<parallel>, #tpu.dimension_semantics<parallel>], iteration_bounds = array<i64: 2, 2>, scalar_prefetch = 0 : i64, scratch_operands = 0 : i64, tpu.core_type = #tpu.core_type<tc>, window_params = [{transform_indices = @transform_0, window_bounds = array<i64: 1, 8, 4096>}, {pipeline_mode = #tpu.pipeline_mode<synchronous>, transform_indices = @transform_1, window_bounds = array<i64: 1, 8, 8>}, {pipeline_mode = #tpu.pipeline_mode<synchronous>, transform_indices = @transform_2, window_bounds = array<i64: 1, 8, 1>}, {transform_indices = @transform_3, window_bounds = array<i64: 1, 8, 4096>}]} {
    %c0 = arith.constant 0 : index
    %c0_0 = arith.constant 0 : index
    %c0_1 = arith.constant 0 : index
    %0 = vector.load %arg3[%c0, %c0_0, %c0_1] : memref<1x8x8xf32, #tpu.memory_space<vmem>>, vector<1x8x8xf32>
    %1 = vector.shape_cast %0 : vector<1x8x8xf32> to vector<8x8xf32>
    %c0_2 = arith.constant 0 : index
    %c0_3 = arith.constant 0 : index
    %c0_4 = arith.constant 0 : index
    %2 = vector.load %arg2[%c0_2, %c0_3, %c0_4] : memref<1x8x4096xf32, #tpu.memory_space<vmem>>, vector<1x8x4096xf32>
    %3 = vector.shape_cast %2 : vector<1x8x4096xf32> to vector<8x4096xf32>
    %cst = arith.constant dense<0.000000e+00> : vector<8x4096xf32>
    %4 = tpu.matmul %1, %3, %cst {dimension_numbers = #tpu.dot_dimension_numbers<[1], [0], [0], [1], [0, 0, 1, 1], [], []>} : vector<8x8xf32>, vector<8x4096xf32>, vector<8x4096xf32> -> vector<8x4096xf32>
    %c0_5 = arith.constant 0 : index
    %c0_6 = arith.constant 0 : index
    %c0_7 = arith.constant 0 : index
    %5 = vector.load %arg4[%c0_5, %c0_6, %c0_7] : memref<1x8x1xf32, #tpu.memory_space<vmem>>, vector<1x8x1xf32>
    %6 = vector.shape_cast %5 : vector<1x8x1xf32> to vector<8x1xf32>
    %7 = vector.broadcast %6 : vector<8x1xf32> to vector<8x4096xf32>
    %8 = arith.addf %4, %7 : vector<8x4096xf32>
    %c0_8 = arith.constant 0 : index
    %c0_9 = arith.constant 0 : index
    %c0_10 = arith.constant 0 : index
    %9 = vector.load %arg5[%c0_8, %c0_9, %c0_10] : memref<1x8x4096xf32, #tpu.memory_space<vmem>>, vector<1x8x4096xf32>
    %10 = vector.shape_cast %9 : vector<1x8x4096xf32> to vector<8x4096xf32>
    %11 = vector.shape_cast %8 : vector<8x4096xf32> to vector<1x8x4096xf32>
    tpu.vector_store %arg5[%c0_8, %c0_9, %c0_10], %11 {strides = array<i32>} : memref<1x8x4096xf32, #tpu.memory_space<vmem>>, vector<1x8x4096xf32>,
    return
  }
  func.func @transform_0(%arg0: i32, %arg1: i32) -> (i32, i32, i32) {
    %c0_i32 = arith.constant 0 : i32
    %c0_i32_0 = arith.constant 0 : i32
    return %arg0, %c0_i32, %arg1 : i32, i32, i32
  }
  func.func @transform_1(%arg0: i32, %arg1: i32) -> (i32, i32, i32) {
    %c0_i32 = arith.constant 0 : i32
    %c0_i32_0 = arith.constant 0 : i32
    %c0_i32_1 = arith.constant 0 : i32
    %c0_i32_2 = arith.constant 0 : i32
    return %c0_i32, %c0_i32_0, %c0_i32_1 : i32, i32, i32
  }
  func.func @transform_2(%arg0: i32, %arg1: i32) -> (i32, i32, i32) {
    %c0_i32 = arith.constant 0 : i32
    %c0_i32_0 = arith.constant 0 : i32
    %c0_i32_1 = arith.constant 0 : i32
    %c0_i32_2 = arith.constant 0 : i32
    return %c0_i32, %c0_i32_0, %c0_i32_1 : i32, i32, i32
  }
  func.func @transform_3(%arg0: i32, %arg1: i32) -> (i32, i32, i32) {
    %c0_i32 = arith.constant 0 : i32
    %c0_i32_0 = arith.constant 0 : i32
    return %arg0, %c0_i32, %arg1 : i32, i32, i32
  }
}

</mosaic_0001>

<bundles_post_ra>
// kernel: tpu_custom_call.1
= control target key start
LH: loop header
LB: loop body
LE: loop exit
PB: predicated region body
PF: predicated region fallthrough
CT: control target
= control target key end

     0   :  { %8 = vsyncpa [#allocation3], 0  ;;  %s2164_s0 = inlined_call_operand.hbm [shape: f32[2,8,5184], index: 0, kind: input, shape index: {}]   ;;  %s2165_s1 = inlined_call_operand.vmem [shape: f32[1,8,8], index: 1, kind: input, shape index: {}]   ;;  %s2166_s2 = inlined_call_operand.vmem [shape: f32[1,8,1], index: 2, kind: input, shape index: {}]   ;;  %s2167_s3 = inlined_call_operand.hbm [shape: f32[2,8,5184], index: 3, kind: output, shape index: {}]  }
   0x1   :  { %10 = vsyncpa [#allocation3 + $0x1], 0 }
   0x2   :  { %11 = vsyncpa [#allocation4], 0 }
   0x3   :  { %13 = vsyncpa [#allocation4 + $0x1], 0  ;;  %s1809_s12 = smov 0   ;;  %s1811_s13 = smov 0  }
   0x4   :  { %s1813_s14 = smov 0   ;;  %s1815_s15 = smov 0  }
   0x5   :  { %s1817_s16 = smov 0   ;;  %s1819_s17 = smov 0  }
   0x6   :  { %s1821_s18 = smov 0   ;;  %s1823_s19 = smov 0  }
   0x7 LB: > { %2172 = sst [smem:[#allocation8_spill]] %s1775_s17  ;;  %s1542_s20 = sadd.s32 4294967295, %s1783_s19   ;;  %s1783_s19 = sphi %s1823_s19, %s19_s19   ;;  %s1779_s18 = sphi %s1821_s18, %s2184_s18   ;;  %s1775_s17 = sphi %s1819_s17, %s2183_s17   ;;  %s1771_s16 = sphi %s1817_s16, %s2182_s16   ;;  %s1767_s15 = sphi %s1815_s15, %s2181_s15   ;;  %s1763_s14 = sphi %s1813_s14, %s2187_s14   ;;  %s1759_s13 = sphi %s1811_s13, %s2186_s13   ;;  %s1755_s12 = sphi %s1809_s12, %s2185_s12  }
   0x8   : > { %2173 = sst [smem:[#allocation9_spill]] %s1779_s18  ;;  %s1543_s21 = sadd.s32 4294967294, %s1783_s19  }
   0x9   : > { %s28_s22 = sadd.s32 1, %s1775_s17  ;;  %s31_s23 = sadd.s32 1, %s1779_s18 }
   0xa   : > { %p29_p0 = scmp.ge.s32.totalorder %s28_s22, 2  ;;  %p47_p1 = scmp.ne.s32.totalorder %s1763_s14, %s1759_s13 }
   0xb   : > { %p48_p2 = scmp.eq.s32.totalorder %s1783_s19, 0  ;;  %p53_p5 = scmp.ne.s32.totalorder %s1759_s13, %s1755_s12 }
   0xc   : > { %s2189_s22 = smov (%p29_p0, %s28_s22), 0  ;;  %s2191_s23 = smov (!%p29_p0, %s31_s23), %s1779_s18 }
   0xd   : > { %2174 = sst [smem:[#allocation10_spill]] %s2189_s22  ;;  %s36_s24 = ssub.s32 %s1775_s17, %s2189_s22 }
   0xe   : > { %p1861_p3 = por %p48_p2, %p47_p1  ;;  %p33_p4 = scmp.ge.s32.totalorder %s2191_s23, 2 }
   0xf   : > { %p54_p6 = scmp.eq.s32.totalorder %s1542_s20, 0  ;;  %p121_p7 = scmp.eq.s32.totalorder %s1542_s20, 3 }
  0x10   : > { %s2193_s23 = smov (%p33_p4, %s2191_s23), 0  ;;  %p127_p10 = scmp.eq.s32.totalorder %s1543_s21, 3 }
  0x11   : > { %2176 = sst [smem:[#allocation11_spill]] %s2193_s23  ;;  %p1869_p8 = por %p54_p6, %p53_p5 }
  0x12   : > { %p1873_p9 = por %p121_p7, %p47_p1  ;;  %s35_s28 = ssub.s32 %s1779_s18, %s2193_s23 }
  0x13   : > { %s37_s29 = sor.u32 %s36_s24, %s35_s28  ;;  %s40_s30 = sadd.s32 1, %s1763_s14 }
  0x14   : > { %p38_p11 = scmp.eq.s32.totalorder %s37_s29, 0  ;;  %p1880_p12 = por %p127_p10, %p53_p5 }
  0x15   : > { %p1545_p13 = scmp.ge.s32.totalorder %s1783_s19, 4 }
  0x16   : > { %s2179_s4 = scalar_select %p1880_p12, 1, 0 }
  0x17   : > { %s1885_s5 = scalar_select %p38_p11, %s1763_s14, %s40_s30  }
  0x18   : > { %149 = sbr.rel (%p1545_p13) target bundleno = 67 (0x43), region = 24 }
  0x1f   : > { %152 = sbr.rel (!%p1861_p3) target bundleno = 67 (0x43), region = 28  ;;  %s153_s6 = sand.u32 (%p1861_p3), 1, %s1763_s14  }
  0x20   : > { %s1547_s7 = sshll.u32 (%p1861_p3), %s1775_s17, 5  ;;  %s1546_s8 = sshll.u32 (%p1861_p3), %s153_s6, 8 }
  0x21   : > { %s159_s9 = ssub.s32 (%p1861_p3), 41, %s1547_s7  ;;  %s1895_s20 = scalar_lea.sflag (%p1861_p3), [#allocation3], %s153_s6 }
  0x22   : > { %p160_p0 = scmp.lt.s32.totalorder (%p1861_p3), %s159_s9, 32  ;;  %s157_s21 = scalar_lea.vmem (%p1861_p3), [#allocation2], %s1546_s8 }
  0x26   : > { %s2195_s9 = smov (!%p160_p0, %s159_s9), 32 }
  0x27   : > { %s1892_s10 = sshll.u32 %s2195_s9, 7 }
  0x28   : > { %s164_s11 = ssub.s32 4096, %s1892_s10 }
  0x29   : > { %165 = vsyncadd %s1895_s20, %s164_s11  ;;  %s1581_s24 = smul.u32 41, %s1779_s18  ;;  %p1549_p1 = scmp.ne.s32.totalorder %s1892_s10, 0 }
  0x2a   : > { %s173_s25 = sshll.u32 %s157_s21, 4  ;;  %s1661_s22 = scalar_lea.hbm %s2164_s0, 10496  ;;  %s1900_s25 = int_to_ptr.vmem [resolvable:$true] %s173_s25 }
  0x2b   : > { %s168_s28 = sadd.s32 %s1581_s24, %s1547_s7 }
  0x2c   : > { %s1550_s29 = sshll.u32 %s168_s28, 7 }
  0x2d   : > { %s170_s23 = scalar_lea.hbm %s2164_s0, %s1550_s29 }
  0x2e   : > { %s1657_s6 = scalar_lea.hbm %s170_s23, %s1892_s10  ;;  %p1662_p5 = scmp.lt.u32.totalorder %s170_s23, %s2164_s0 }
  0x2f   : > { %p1658_p2 = scmp.ne.s32.totalorder %s170_s23, %s1657_s6  ;;  %p1663_p6 = scmp.lt.u32.totalorder %s1661_s22, %s1657_s6 }
  0x30   : > { %p1665_p10 = scmp.lt.u32.totalorder %s1657_s6, %s170_s23 }
  0x31   : > { %p1659_p3 = pnand %p1658_p2, %p1549_p1  ;;  %p1664_p7 = por %p1663_p6, %p1662_p5 }
  0x33   : > { %p1660_p4 = pneg %p1659_p3  ;;  %p1666_p11 = por %p1665_p10, %p1664_p7 }
  0x35   : > { %p1667_p13 = pnand %p1666_p11, %p1660_p4 }
  0x37   : > { %1670 = shalt.err (!%p1667_p13)
}
  0x38   : > { %s1671_s7 = scalar_lea.vmem %s1900_s25, %s1892_s10  ;;  %s1785_s21 = smov [#allocation2]  }
  0x39   : > { %p1672_p0 = scmp.ne.s32.totalorder %s1900_s25, %s1671_s7  ;;  %s1675_s24 = sshll.u32 %s1785_s21, 4  ;;  %s1676_s24 = int_to_ptr.vmem [resolvable:$false] %s1675_s24 }
  0x3a   : > { %s1677_s17 = scalar_lea.vmem %s1676_s24, 8192  ;;  %p1678_p12 = scmp.lt.s32.totalorder %s1900_s25, %s1676_s24 }
  0x3b   : > { %p1673_p2 = pnand %p1672_p0, %p1549_p1  ;;  %p1679_p5 = scmp.lt.s32.totalorder %s1677_s17, %s1671_s7 }
  0x3d   : > { %p1674_p3 = pneg %p1673_p2  ;;  %p1680_p6 = por %p1679_p5, %p1678_p12 }
  0x3f   : > { %p1681_p7 = pnand %p1680_p6, %p1674_p3 }
  0x41   : > { %1684 = shalt.err (!%p1681_p7)
}
  0x42   : > { %176 = dma.hbm_to_vmem [thread:$0]  (%p1549_p1), %s170_s23, %s1892_s10, %s1900_s25, %s1895_s20  }
  0x43 PF: > { %p1553_p4 = scmp.ge.s32.totalorder %s1783_s19, 1  ;;  %p178_p10 = scmp.lt.s32.totalorder %s1783_s19, 5 }
  0x45   : > { %p179_p11 = pnand %p1553_p4, %p178_p10 }
  0x46   : > { %s1928_s18 = sand.u32 (!%p179_p11), 1, %s1759_s13  }
  0x47   : > { %182 = sbr.rel (%p179_p11) target bundleno = 356 (0x164), region = 32  ;;  %s1554_s22 = sshll.u32 (!%p179_p11), %s1928_s18, 8 }
  0x48   : > { %s185_s28 = scalar_lea.sflag (!%p179_p11), [#allocation3], %s1928_s18  ;;  %s1934_s29 = scalar_lea.vmem (!%p179_p11), [#allocation2], %s1554_s22 }
  0x4e   : > { %1746 = dma.done.wait (%p1869_p8), %s185_s28, 4096  }
  0x4f   : > { %1748 = vsyncadd (%p1869_p8), %s185_s28, 4294963200  ;;  %v1786_v0 = vmov 0.0   ;;  %v1787_v1 = vmov 0   ;;  %v223_v2 = vld [vmem:[%s1934_s29 + $0x8] sm:$0xff]  ;;  %v225_v3 = vld [vmem:[%s1934_s29 + $0x18] sm:$0xff]  ;;  %vm260_vm0 = vcmask 64512  }
  0x50   : > { %328 = vmatprep.mubr.f32.mxu0 %v1786_v0  ;;  %399 = vmatprep.mubr.f32.mxu1 %v1786_v0  ;;  %v222_v4 = vld [vmem:[%s1934_s29] sm:$0xff]  ;;  %v224_v5 = vld [vmem:[%s1934_s29 + $0x10] sm:$0xff]  ;;  %v227_v7 = vld [vmem:[%s1934_s29 + $0x28] sm:$0xff]  ;;  %s2036_s25 = scalar_lea.vmem [#allocation5], %s1554_s22  ;;  %s1433_s30 = scalar_lea.sflag [#allocation4], %s1928_s18 }
  0x51   : > { %1656 = vset.pattern.permute.xlu0 %v1787_v1  ;;  %264 = vmatprep.subr.mxu0 %v223_v2  ;;  %v1949_v6 = vld [vmem:[%s2165_s1] sm:$0xff]  ;;  %v229_v8 = vld [vmem:[%s1934_s29 + $0x38] sm:$0xff]  ;;  %v228_v10 = vld [vmem:[%s1934_s29 + $0x30] sm:$0xff]  ;;  %s1573_s9 = sshll.u32 (%p1873_p9), %s1767_s15, 5 }
  0x52   : > { %335 = vmatprep.subr.mxu1 %v225_v3  ;;  %265 = vmatpush1.msra.mxu0 %v222_v4  ;;  %v226_v9 = vld [vmem:[%s1934_s29 + $0x20] sm:$0xff]  ;;  %v231_v11 = vld [vmem:[%s1934_s29 + $0x48] sm:$0xff]  ;;  %v233_v12 = vld [vmem:[%s1934_s29 + $0x58] sm:$0xff]  ;;  %s1441_s6 = ssub.s32 (%p1873_p9), 41, %s1573_s9 }
  0x53   : > { %336 = vmatpush1.msra.mxu1 %v224_v5  ;;  %1556 = vmatmul.mubr.msk.f32.vlgmr.msra.gmra.mrb[0].mxu0 %vm260_vm0, %v1949_v6  ;;  %v230_v13 = vld [vmem:[%s1934_s29 + $0x40] sm:$0xff]  ;;  %v232_v14 = vld [vmem:[%s1934_s29 + $0x50] sm:$0xff]  ;;  %v235_v15 = vld [vmem:[%s1934_s29 + $0x68] sm:$0xff]  ;;  %p1442_p8 = scmp.lt.s32.totalorder (%p1873_p9), %s1441_s6, 32 }
  0x54   : > { %1557 = vmatmul.mubr.msk.f32.vlgmr.msra.gmra.mrb[0].mxu1 %vm260_vm0, %v1949_v6  ;;  %406 = vmatprep.subr.mxu0 %v227_v7  ;;  %v237_v16 = vld [vmem:[%s1934_s29 + $0x78] sm:$0xff]  ;;  %v234_v17 = vld [vmem:[%s1934_s29 + $0x60] sm:$0xff]  ;;  %v236_v18 = vld [vmem:[%s1934_s29 + $0x70] sm:$0xff] }
  0x55   : > { %477 = vmatprep.subr.mxu1 %v229_v8  ;;  %407 = vmatpush1.msra.mxu0 %v226_v9  ;;  %v239_v19 = vld [vmem:[%s1934_s29 + $0x88] sm:$0xff]  ;;  %v241_v20 = vld [vmem:[%s1934_s29 + $0x98] sm:$0xff]  ;;  %v238_v21 = vld [vmem:[%s1934_s29 + $0x80] sm:$0xff] }
  0x56   : > { %478 = vmatpush1.msra.mxu1 %v228_v10  ;;  %470 = vmatprep.mubr.f32.mxu0 %v1786_v0  ;;  %v240_v22 = vld [vmem:[%s1934_s29 + $0x90] sm:$0xff]  ;;  %v243_v23 = vld [vmem:[%s1934_s29 + $0xa8] sm:$0xff]  ;;  %v245_v24 = vld [vmem:[%s1934_s29 + $0xb8] sm:$0xff] }
  0x57   : > { %541 = vmatprep.mubr.f32.mxu1 %v1786_v0  ;;  %1558 = vmatmul.mubr.msk.f32.vlgmr.msra.gmra.mrb[2].mxu0 %vm260_vm0, %v1949_v6  ;;  %v242_v25 = vld [vmem:[%s1934_s29 + $0xa0] sm:$0xff]  ;;  %v244_v26 = vld [vmem:[%s1934_s29 + $0xb0] sm:$0xff]  ;;  %v247_v27 = vld [vmem:[%s1934_s29 + $0xc8] sm:$0xff] }
  0x58   : > { %1559 = vmatmul.mubr.msk.f32.vlgmr.msra.gmra.mrb[2].mxu1 %vm260_vm0, %v1949_v6  ;;  %548 = vmatprep.subr.mxu0 %v231_v11  ;;  %v249_v28 = vld [vmem:[%s1934_s29 + $0xd8] sm:$0xff]  ;;  %v246_v29 = vld [vmem:[%s1934_s29 + $0xc0] sm:$0xff]  ;;  %v248_v30 = vld [vmem:[%s1934_s29 + $0xd0] sm:$0xff] }
  0x59   : > { %619 = vmatprep.subr.mxu1 %v233_v12  ;;  %549 = vmatpush1.msra.mxu0 %v230_v13  ;;  %v251_v31 = vld [vmem:[%s1934_s29 + $0xe8] sm:$0xff]  ;;  %v253_v32 = vld [vmem:[%s1934_s29 + $0xf8] sm:$0xff]  ;;  %v250_v33 = vld [vmem:[%s1934_s29 + $0xe0] sm:$0xff] }
  0x5a   : > { %620 = vmatpush1.msra.mxu1 %v232_v14  ;;  %612 = vmatprep.mubr.f32.mxu0 %v1786_v0  ;;  %v252_v34 = vld [vmem:[%s1934_s29 + $0xf0] sm:$0xff]  ;;  %v254_v35 = vld [vmem:[%s2166_s2] sm:$0xff] }
  0x5b   : > { %683 = vmatprep.mubr.f32.mxu1 %v1786_v0  ;;  %1560 = vmatmul.mubr.msk.f32.vlgmr.msra.gmra.mrb[4].mxu0 %vm260_vm0, %v1949_v6 }
  0x5c   : > { %1561 = vmatmul.mubr.msk.f32.vlgmr.msra.gmra.mrb[4].mxu1 %vm260_vm0, %v1949_v6  ;;  %690 = vmatprep.subr.mxu0 %v235_v15 }
  0x5d   : > { %761 = vmatprep.subr.mxu1 %v237_v16  ;;  %691 = vmatpush1.msra.mxu0 %v234_v17 }
  0x5e   : > { %762 = vmatpush1.msra.mxu1 %v236_v18  ;;  %754 = vmatprep.mubr.f32.mxu0 %v1786_v0 }
  0x5f   : > { %825 = vmatprep.mubr.f32.mxu1 %v1786_v0  ;;  %1562 = vmatmul.mubr.msk.f32.vlgmr.msra.gmra.mrb[6].mxu0 %vm260_vm0, %v1949_v6 }
  0x60   : > { %1563 = vmatmul.mubr.msk.f32.vlgmr.msra.gmra.mrb[6].mxu1 %vm260_vm0, %v1949_v6  ;;  %832 = vmatprep.subr.mxu0 %v239_v19 }
  0x61   : > { %903 = vmatprep.subr.mxu1 %v241_v20  ;;  %833 = vmatpush1.msra.mxu0 %v238_v21 }
  0x62   : > { %904 = vmatpush1.msra.mxu1 %v240_v22  ;;  %896 = vmatprep.mubr.f32.mxu0 %v1786_v0 }
  0x63   : > { %967 = vmatprep.mubr.f32.mxu1 %v1786_v0  ;;  %1564 = vmatmul.mubr.msk.f32.vlgmr.msra.gmra.mrb[8].mxu0 %vm260_vm0, %v1949_v6 }
  0x64   : > { %1565 = vmatmul.mubr.msk.f32.vlgmr.msra.gmra.mrb[8].mxu1 %vm260_vm0, %v1949_v6  ;;  %974 = vmatprep.subr.mxu0 %v243_v23 }
  0x65   : > { %1045 = vmatprep.subr.mxu1 %v245_v24  ;;  %975 = vmatpush1.msra.mxu0 %v242_v25 }
  0x66   : > { %1046 = vmatpush1.msra.mxu1 %v244_v26  ;;  %1038 = vmatprep.mubr.f32.mxu0 %v1786_v0 }
  0x67   : > { %1109 = vmatprep.mubr.f32.mxu1 %v1786_v0  ;;  %1566 = vmatmul.mubr.msk.f32.vlgmr.msra.gmra.mrb[10].mxu0 %vm260_vm0, %v1949_v6 }
  0x68   : > { %1567 = vmatmul.mubr.msk.f32.vlgmr.msra.gmra.mrb[10].mxu1 %vm260_vm0, %v1949_v6  ;;  %1116 = vmatprep.subr.mxu0 %v247_v27 }
  0x69   : > { %1187 = vmatprep.subr.mxu1 %v249_v28  ;;  %1117 = vmatpush1.msra.mxu0 %v246_v29 }
  0x6a   : > { %1188 = vmatpush1.msra.mxu1 %v248_v30  ;;  %1180 = vmatprep.mubr.f32.mxu0 %v1786_v0 }
  0x6b   : > { %1251 = vmatprep.mubr.f32.mxu1 %v1786_v0  ;;  %1568 = vmatmul.mubr.msk.f32.vlgmr.msra.gmra.mrb[12].mxu0 %vm260_vm0, %v1949_v6 }
  0x6c   : > { %1569 = vmatmul.mubr.msk.f32.vlgmr.msra.gmra.mrb[12].mxu1 %vm260_vm0, %v1949_v6  ;;  %1258 = vmatprep.subr.mxu0 %v251_v31 }
  0x6d   : > { %1329 = vmatprep.subr.mxu1 %v253_v32  ;;  %1259 = vmatpush1.msra.mxu0 %v250_v33 }
  0x6e   : > { %1330 = vmatpush1.msra.mxu1 %v252_v34  ;;  %1322 = vmatprep.mubr.f32.mxu0 %v1786_v0 }
  0x6f   : > { %1393 = vmatprep.mubr.f32.mxu1 %v1786_v0  ;;  %1570 = vmatmul.mubr.msk.f32.vlgmr.msra.gmra.mrb[14].mxu0 %vm260_vm0, %v1949_v6 }
  0x70   : > { %1571 = vmatmul.mubr.msk.f32.vlgmr.msra.gmra.mrb[14].mxu1 %vm260_vm0, %v1949_v6  ;;  %257 = vperm.xlu0 %1656, %v254_v35  }
  0xef   : > { %v2028_v36 = vpop.permute.xlu0 %257 }
 0x126   : > { %v330_v37 = vpop.f32.mrb[0].mxu0 }
 0x127   : > { %v401_v38 = vpop.f32.mrb[0].mxu1  ;;  %v331_v39 = vadd.f32 %v330_v37, %v2028_v36  ;;  %v332_v41 = vpop.f32.mrb[1].mxu0 }
 0x128   : > { %v402_v40 = vadd.f32 %v401_v38, %v2028_v36  ;;  %v403_v42 = vpop.f32.mrb[1].mxu1  ;;  %v333_v43 = vadd.f32 %v332_v41, %v2028_v36 }
 0x129   : > { %v404_v44 = vadd.f32 %v403_v42, %v2028_v36  ;;  %1400 = vst [vmem:[%s2036_s25] sm:$0xff] %v331_v39 }
 0x12a   : > { %1402 = vst [vmem:[%s2036_s25 + $0x10] sm:$0xff] %v402_v40  ;;  %1401 = vst [vmem:[%s2036_s25 + $0x8] sm:$0xff] %v333_v43  ;;  %v472_v45 = vpop.f32.mrb[2].mxu0 }
 0x12b   : > { %1403 = vst [vmem:[%s2036_s25 + $0x18] sm:$0xff] %v404_v44  ;;  %v543_v46 = vpop.f32.mrb[2].mxu1  ;;  %v473_v47 = vadd.f32 %v472_v45, %v2028_v36  ;;  %v474_v49 = vpop.f32.mrb[3].mxu0 }
 0x12c   : > { %v544_v48 = vadd.f32 %v543_v46, %v2028_v36  ;;  %v545_v50 = vpop.f32.mrb[3].mxu1  ;;  %v475_v51 = vadd.f32 %v474_v49, %v2028_v36 }
 0x12d   : > { %v546_v52 = vadd.f32 %v545_v50, %v2028_v36  ;;  %1404 = vst [vmem:[%s2036_s25 + $0x20] sm:$0xff] %v473_v47 }
 0x12e   : > { %1406 = vst [vmem:[%s2036_s25 + $0x30] sm:$0xff] %v544_v48  ;;  %1405 = vst [vmem:[%s2036_s25 + $0x28] sm:$0xff] %v475_v51  ;;  %v614_v53 = vpop.f32.mrb[4].mxu0 }
 0x12f   : > { %1407 = vst [vmem:[%s2036_s25 + $0x38] sm:$0xff] %v546_v52  ;;  %v685_v54 = vpop.f32.mrb[4].mxu1  ;;  %v615_v55 = vadd.f32 %v614_v53, %v2028_v36  ;;  %v616_v57 = vpop.f32.mrb[5].mxu0 }
 0x130   : > { %v686_v56 = vadd.f32 %v685_v54, %v2028_v36  ;;  %v687_v58 = vpop.f32.mrb[5].mxu1  ;;  %v617_v59 = vadd.f32 %v616_v57, %v2028_v36 }
 0x131   : > { %v688_v60 = vadd.f32 %v687_v58, %v2028_v36  ;;  %1408 = vst [vmem:[%s2036_s25 + $0x40] sm:$0xff] %v615_v55 }
 0x132   : > { %1410 = vst [vmem:[%s2036_s25 + $0x50] sm:$0xff] %v686_v56  ;;  %1409 = vst [vmem:[%s2036_s25 + $0x48] sm:$0xff] %v617_v59  ;;  %v756_v61 = vpop.f32.mrb[6].mxu0 }
 0x133   : > { %1411 = vst [vmem:[%s2036_s25 + $0x58] sm:$0xff] %v688_v60  ;;  %v827_v62 = vpop.f32.mrb[6].mxu1  ;;  %v757_v63 = vadd.f32 %v756_v61, %v2028_v36  ;;  %v758_v1 = vpop.f32.mrb[7].mxu0 }
 0x134   : > { %v828_v0 = vadd.f32 %v827_v62, %v2028_v36  ;;  %v829_v2 = vpop.f32.mrb[7].mxu1  ;;  %v759_v3 = vadd.f32 %v758_v1, %v2028_v36 }
 0x135   : > { %v830_v4 = vadd.f32 %v829_v2, %v2028_v36  ;;  %1412 = vst [vmem:[%s2036_s25 + $0x60] sm:$0xff] %v757_v63 }
 0x136   : > { %1414 = vst [vmem:[%s2036_s25 + $0x70] sm:$0xff] %v828_v0  ;;  %1413 = vst [vmem:[%s2036_s25 + $0x68] sm:$0xff] %v759_v3  ;;  %v898_v5 = vpop.f32.mrb[8].mxu0 }
 0x137   : > { %1415 = vst [vmem:[%s2036_s25 + $0x78] sm:$0xff] %v830_v4  ;;  %v969_v6 = vpop.f32.mrb[8].mxu1  ;;  %v899_v7 = vadd.f32 %v898_v5, %v2028_v36  ;;  %v900_v9 = vpop.f32.mrb[9].mxu0 }
 0x138   : > { %v970_v8 = vadd.f32 %v969_v6, %v2028_v36  ;;  %v971_v10 = vpop.f32.mrb[9].mxu1  ;;  %v901_v11 = vadd.f32 %v900_v9, %v2028_v36 }
 0x139   : > { %v972_v12 = vadd.f32 %v971_v10, %v2028_v36  ;;  %1416 = vst [vmem:[%s2036_s25 + $0x80] sm:$0xff] %v899_v7 }
 0x13a   : > { %1418 = vst [vmem:[%s2036_s25 + $0x90] sm:$0xff] %v970_v8  ;;  %1417 = vst [vmem:[%s2036_s25 + $0x88] sm:$0xff] %v901_v11  ;;  %v1040_v13 = vpop.f32.mrb[10].mxu0 }
 0x13b   : > { %1419 = vst [vmem:[%s2036_s25 + $0x98] sm:$0xff] %v972_v12  ;;  %v1111_v14 = vpop.f32.mrb[10].mxu1  ;;  %v1041_v15 = vadd.f32 %v1040_v13, %v2028_v36  ;;  %v1042_v17 = vpop.f32.mrb[11].mxu0 }
 0x13c   : > { %v1112_v16 = vadd.f32 %v1111_v14, %v2028_v36  ;;  %v1113_v18 = vpop.f32.mrb[11].mxu1  ;;  %v1043_v19 = vadd.f32 %v1042_v17, %v2028_v36 }
 0x13d   : > { %v1114_v20 = vadd.f32 %v1113_v18, %v2028_v36  ;;  %1420 = vst [vmem:[%s2036_s25 + $0xa0] sm:$0xff] %v1041_v15 }
 0x13e   : > { %1422 = vst [vmem:[%s2036_s25 + $0xb0] sm:$0xff] %v1112_v16  ;;  %1421 = vst [vmem:[%s2036_s25 + $0xa8] sm:$0xff] %v1043_v19  ;;  %v1182_v21 = vpop.f32.mrb[12].mxu0 }
 0x13f   : > { %1423 = vst [vmem:[%s2036_s25 + $0xb8] sm:$0xff] %v1114_v20  ;;  %v1253_v22 = vpop.f32.mrb[12].mxu1  ;;  %v1183_v23 = vadd.f32 %v1182_v21, %v2028_v36  ;;  %v1184_v25 = vpop.f32.mrb[13].mxu0 }
 0x140   : > { %v1254_v24 = vadd.f32 %v1253_v22, %v2028_v36  ;;  %v1255_v26 = vpop.f32.mrb[13].mxu1  ;;  %v1185_v27 = vadd.f32 %v1184_v25, %v2028_v36 }
 0x141   : > { %v1256_v28 = vadd.f32 %v1255_v26, %v2028_v36  ;;  %1424 = vst [vmem:[%s2036_s25 + $0xc0] sm:$0xff] %v1183_v23  ;;  %1439 = sbr.rel (!%p1873_p9) target bundleno = 356 (0x164), region = 40 }
 0x142   : > { %1426 = vst [vmem:[%s2036_s25 + $0xd0] sm:$0xff] %v1254_v24  ;;  %1425 = vst [vmem:[%s2036_s25 + $0xc8] sm:$0xff] %v1185_v27  ;;  %v1324_v29 = vpop.f32.mrb[14].mxu0 }
 0x143   : > { %1427 = vst [vmem:[%s2036_s25 + $0xd8] sm:$0xff] %v1256_v28  ;;  %v1395_v30 = vpop.f32.mrb[14].mxu1  ;;  %v1325_v31 = vadd.f32 %v1324_v29, %v2028_v36  ;;  %v1326_v33 = vpop.f32.mrb[15].mxu0 }
 0x144   : > { %v1396_v32 = vadd.f32 %v1395_v30, %v2028_v36  ;;  %v1397_v34 = vpop.f32.mrb[15].mxu1  ;;  %v1327_v35 = vadd.f32 %v1326_v33, %v2028_v36 }
 0x145   : > { %v1398_v37 = vadd.f32 %v1397_v34, %v2028_v36  ;;  %1428 = vst [vmem:[%s2036_s25 + $0xe0] sm:$0xff] %v1325_v31 }
 0x146   : > { %1430 = vst [vmem:[%s2036_s25 + $0xf0] sm:$0xff] %v1396_v32  ;;  %1429 = vst [vmem:[%s2036_s25 + $0xe8] sm:$0xff] %v1327_v35 }
 0x147   : > { %1431 = vst [vmem:[%s2036_s25 + $0xf8] sm:$0xff] %v1398_v37 }
 0x148   : > { %s2197_s6 = smov (!%p1442_p8, %s1441_s6), 32 }
 0x149   : > { %s2102_s8 = sshll.u32 %s2197_s6, 7 }
 0x14a   : > { %s1446_s11 = ssub.s32 4096, %s2102_s8 }
 0x14b   : > { %1447 = vsyncadd %s1433_s30, %s1446_s11  ;;  %s1582_s7 = smul.u32 41, %s1771_s16  ;;  %p1575_p12 = scmp.ne.s32.totalorder %s2102_s8, 0 }
 0x14c   : > { %s1455_s27 = sshll.u32 %s2036_s25, 4  ;;  %s1788_s29 = smov [#allocation5]   ;;  %s2110_s27 = int_to_ptr.vmem [resolvable:$true] %s1455_s27 }
 0x14d   : > { %s1450_s21 = sadd.s32 %s1582_s7, %s1573_s9  ;;  %s1685_s28 = scalar_lea.vmem %s2110_s27, %s2102_s8 }
 0x14e   : > { %s1576_s15 = sshll.u32 %s1450_s21, 7  ;;  %p1686_p9 = scmp.ne.s32.totalorder %s2110_s27, %s1685_s28 }
 0x14f   : > { %s1452_s22 = scalar_lea.hbm %s2167_s3, %s1576_s15  ;;  %s1689_s16 = sshll.u32 %s1788_s29, 4  ;;  %s1690_s16 = int_to_ptr.vmem [resolvable:$false] %s1689_s16 }
 0x150   : > { %p1687_p1 = pnand %p1686_p9, %p1575_p12  ;;  %s1691_s23 = scalar_lea.vmem %s1690_s16, 8192 }
 0x151   : > { %p1692_p0 = scmp.lt.s32.totalorder %s2110_s27, %s1690_s16  ;;  %p1693_p2 = scmp.lt.s32.totalorder %s1691_s23, %s1685_s28 }
 0x152   : > { %p1688_p13 = pneg %p1687_p1 }
 0x153   : > { %p1694_p3 = por %p1693_p2, %p1692_p0 }
 0x155   : > { %p1695_p5 = pnand %p1694_p3, %p1688_p13 }
 0x157   : > { %1698 = shalt.err (!%p1695_p5)
}
 0x158   : > { %s1699_s26 = scalar_lea.hbm %s1452_s22, %s2102_s8  ;;  %s1703_s25 = scalar_lea.hbm %s2167_s3, 10496 }
 0x159   : > { %p1700_p6 = scmp.ne.s32.totalorder %s1452_s22, %s1699_s26  ;;  %p1704_p10 = scmp.lt.u32.totalorder %s1452_s22, %s2167_s3 }
 0x15a   : > { %p1705_p11 = scmp.lt.u32.totalorder %s1703_s25, %s1699_s26  ;;  %p1707_p9 = scmp.lt.u32.totalorder %s1699_s26, %s1452_s22 }
 0x15b   : > { %p1701_p7 = pnand %p1700_p6, %p1575_p12 }
 0x15c   : > { %p1706_p8 = por %p1705_p11, %p1704_p10 }
 0x15d   : > { %p1702_p4 = pneg %p1701_p7 }
 0x15e   : > { %p1708_p1 = por %p1707_p9, %p1706_p8 }
 0x160   : > { %p1709_p13 = pnand %p1708_p1, %p1702_p4 }
 0x162   : > { %1712 = shalt.err (!%p1709_p13)
}
 0x163   : > { %1458 = dma.vmem_to_hbm [thread:$0]  (%p1575_p12), %s2110_s27, %s2102_s8, %s1452_s22, %s1433_s30  }
 0x164 PF: > { %p1589_p0 = scmp.ge.s32.totalorder %s1783_s19, 2  ;;  %s1467_s11 = sand.u32 1, %s1755_s12  }
 0x165   : > { %p2180_p2 = scmp.ne.s32.totalorder %s2179_s4, 0  ;;  %s1468_s7 = scalar_lea.sflag [#allocation4], %s1467_s11 }
 0x167   : > { %p1586_p3 = pnand %p1589_p0, %p2180_p2 }
 0x169   : > { %1750 = dma.done.wait (!%p1586_p3), %s1468_s7, 4096  }
 0x16a   : > { %1752 = vsyncadd (!%p1586_p3), %s1468_s7, 4294963200  ;;  %s19_s19 = sadd.s32 1, %s1783_s19   ;;  %s2181_s15 = sld [smem:[#allocation8_spill]] }
 0x16b   : > { %p16_p5 = scmp.ge.s32.totalorder %s19_s19, 6   ;;  %s2182_s16 = sld [smem:[#allocation9_spill]] }
 0x16c   : > { %s2183_s17 = sld [smem:[#allocation10_spill]]  ;;  %s2184_s18 = sld [smem:[#allocation11_spill]] }
 0x16d   : > { %s2185_s12 = smov %s1759_s13  ;;  %s2186_s13 = smov %s1763_s14 }
 0x16e   : > { %s2187_s14 = smov %s1885_s5  ;;  %18 = sbr.rel (!%p16_p5) target bundleno = 7 (0x7), region = 77 }
 0x175   :  { %1473 = vsyncpa [#allocation3], 1 }
 0x176   :  { %1475 = vsyncpa [#allocation3 + $0x1], 1 }
 0x177   :  { %1476 = vsyncpa [#allocation4], 1 }
 0x178   :  { %1478 = vsyncpa [#allocation4 + $0x1], 1 }

</bundles_post_ra>
